<compile_context>
chip_gen: v7x
topology: tpu7x:2x2x1
jax: 0.10.0
libtpu: 0.0.40
codegen_flags: <defaults>
</compile_context>

<pallas_src>
import functools
import math

import jax
import jax.numpy as jnp
from jax.experimental import pallas as pl
from jax.experimental.pallas import tpu as pltpu


# ----------------------------------------------------------------------------
# Helpers
# ----------------------------------------------------------------------------

def _dot(a, b, contract_dims, compute_dtype):
    """a·b with the given contraction dims, MXU operands in compute_dtype,
    f32 accumulation."""
    return jax.lax.dot_general(
        a.astype(compute_dtype), b.astype(compute_dtype),
        (contract_dims, ((), ())), preferred_element_type=jnp.float32)


def _choose_tile(dim, target):
    """Largest multiple-of-8 divisor of `dim` that is <= target (or dim)."""
    if dim <= target:
        return dim
    for t in range(target, 0, -8):
        if dim % t == 0:
            return t
    return dim


# ----------------------------------------------------------------------------
# Stage 1: K / V projections (computed once per batch, not per q-row tile)
# ----------------------------------------------------------------------------

def _kv_proj_kernel(xk_ref, xv_ref, wk_ref, bk_ref, wv_ref, bv_ref,
                    ko_ref, vo_ref, *, compute_dtype):
    k = _dot(xk_ref[0], wk_ref[...], ((1,), (0,)), compute_dtype) + bk_ref[...]
    v = _dot(xv_ref[0], wv_ref[...], ((1,), (0,)), compute_dtype) + bv_ref[...]
    ko_ref[0] = k.astype(ko_ref.dtype)
    vo_ref[0] = v.astype(vo_ref.dtype)


# ----------------------------------------------------------------------------
# Stage 2: fused Q-projection + online-softmax attention + output projection
# ----------------------------------------------------------------------------

def _attn_kernel(q_ref, k_ref, v_ref, wq_ref, bq_ref, wo_ref, bo_ref, *rest,
                 heads, scale, has_mask, compute_dtype):
    if has_mask:
        mask_ref, o_ref, q_scr, m_scr, l_scr, acc_scr = rest
    else:
        o_ref, q_scr, m_scr, l_scr, acc_scr = rest

    kv = pl.program_id(2)
    nkv = pl.num_programs(2)

    # Project (and scale) Q once per (batch, q-tile); init online-softmax state.
    @pl.when(kv == 0)
    def _():
        q = _dot(q_ref[0], wq_ref[...], ((1,), (0,)), compute_dtype) + bq_ref[...]
        q_scr[...] = (q * jnp.float32(scale)).astype(q_scr.dtype)
        m_scr[...] = jnp.full_like(m_scr, -jnp.inf)
        l_scr[...] = jnp.zeros_like(l_scr)
        acc_scr[...] = jnp.zeros_like(acc_scr)

    q_full = q_scr[...]          # (tq, E)  compute_dtype
    k = k_ref[0]                 # (tk, E)  compute_dtype (pre-projected)
    v = v_ref[0]                 # (tk, E)  compute_dtype (pre-projected)

    # Mask -> additive bias, computed ONCE per kv tile (hoisted out of the
    # per-head loop; mask is shared across heads).
    if has_mask:
        bias = jnp.where(mask_ref[0, 0] == 0,
                         jnp.float32(-1e20), jnp.float32(0.0))   # (tq, tk)

    E = q_full.shape[-1]
    hd = E // heads

    # Per-head online softmax; heads is small & static so the loop unrolls.
    for h in range(heads):
        lo, hi = h * hd, (h + 1) * hd
        qh = q_full[:, lo:hi]                          # (tq, hd)
        kh = k[:, lo:hi]                               # (tk, hd)
        vh = v[:, lo:hi]                               # (tk, hd)

        s = _dot(qh, kh, ((1,), (1,)), compute_dtype)  # (tq, tk) f32
        if has_mask:
            s = s + bias

        m_prev = m_scr[h]                              # (tq, 1)
        m_new = jnp.maximum(m_prev, jnp.max(s, axis=-1, keepdims=True))
        alpha = jnp.exp(m_prev - m_new)
        p = jnp.exp(s - m_new)                         # (tq, tk) f32
        l_scr[h] = alpha * l_scr[h] + jnp.sum(p, axis=-1, keepdims=True)
        acc_scr[:, lo:hi] = (alpha * acc_scr[:, lo:hi]
                             + _dot(p, vh, ((1,), (0,)), compute_dtype))
        m_scr[h] = m_new
        # TODO(synk): dropout on the probabilities skipped (eval-mode identity).

    # Final kv tile: normalize per head, output projection, store lane-dense.
    @pl.when(kv == nkv - 1)
    def _():
        for h in range(heads):
            lo, hi = h * hd, (h + 1) * hd
            acc_scr[:, lo:hi] = acc_scr[:, lo:hi] * pl.reciprocal(
                l_scr[h], approx=False)
        out = _dot(acc_scr[...], wo_ref[...], ((1,), (0,)),
                   compute_dtype) + bo_ref[...]
        o_ref[0] = out.astype(o_ref.dtype)


# ----------------------------------------------------------------------------
# Wrapper
# ----------------------------------------------------------------------------

def multi_head_attention(params, query, key, value, mask=None, *, num_heads,
                         block_q=None, block_k=None, use_bf16=True):
    """Fused MHA forward.  query: (B, Sq, E); key/value: (B, Sk, E);
    mask broadcastable to (B, 1, Sq, Sk) (nonzero = keep, 0 = masked) or None."""
    B, Sq, E = query.shape
    Sk = key.shape[1]
    hd = E // num_heads
    assert hd * num_heads == E, "embed_size must be divisible by num_heads"

    compute_dtype = jnp.bfloat16 if use_bf16 else jnp.float32

    # Weights at MXU-operand width (half DMA / VMEM when bf16); biases stay f32.
    wq = params["wq"].astype(compute_dtype)
    wk = params["wk"].astype(compute_dtype)
    wv = params["wv"].astype(compute_dtype)
    wo = params["wo"].astype(compute_dtype)
    bq = params["bq"].reshape(1, E).astype(jnp.float32)
    bk = params["bk"].reshape(1, E).astype(jnp.float32)
    bv = params["bv"].reshape(1, E).astype(jnp.float32)
    bo = params["bo"].reshape(1, E).astype(jnp.float32)

    # ---- Stage 1: K/V projections, once per batch ----
    tkp = _choose_tile(Sk, 512)
    k_proj, v_proj = pl.pallas_call(
        functools.partial(_kv_proj_kernel, compute_dtype=compute_dtype),
        out_shape=(jax.ShapeDtypeStruct((B, Sk, E), compute_dtype),
                   jax.ShapeDtypeStruct((B, Sk, E), compute_dtype)),
        grid=(B, Sk // tkp),
        in_specs=[
            pl.BlockSpec((1, tkp, E), lambda b, s: (b, s, 0)),   # key rows
            pl.BlockSpec((1, tkp, E), lambda b, s: (b, s, 0)),   # value rows
            pl.BlockSpec((E, E), lambda b, s: (0, 0)),           # Wk (resident)
            pl.BlockSpec((1, E), lambda b, s: (0, 0)),           # bk
            pl.BlockSpec((E, E), lambda b, s: (0, 0)),           # Wv (resident)
            pl.BlockSpec((1, E), lambda b, s: (0, 0)),           # bv
        ],
        out_specs=(pl.BlockSpec((1, tkp, E), lambda b, s: (b, s, 0)),
                   pl.BlockSpec((1, tkp, E), lambda b, s: (b, s, 0))),
        compiler_params=pltpu.CompilerParams(
            dimension_semantics=("parallel", "parallel")),
    )(key, value, wk, bk, wv, bv)

    # ---- Stage 2: attention ----
    tq = block_q if block_q is not None else _choose_tile(Sq, 256)
    tk = block_k if block_k is not None else _choose_tile(Sk, 512)
    assert Sq % tq == 0 and Sk % tk == 0

    has_mask = mask is not None
    if has_mask and tk != Sk and tk % 128 != 0:
        # The mask block's lane dim must be a multiple of 128 or the full Sk.
        tk = Sk
    grid = (B, Sq // tq, Sk // tk)

    in_specs = [
        pl.BlockSpec((1, tq, E), lambda b, qi, ki: (b, qi, 0)),   # query rows
        pl.BlockSpec((1, tk, E), lambda b, qi, ki: (b, ki, 0)),   # K_proj tile
        pl.BlockSpec((1, tk, E), lambda b, qi, ki: (b, ki, 0)),   # V_proj tile
        pl.BlockSpec((E, E), lambda b, qi, ki: (0, 0)),           # Wq (resident)
        pl.BlockSpec((1, E), lambda b, qi, ki: (0, 0)),           # bq
        pl.BlockSpec((E, E), lambda b, qi, ki: (0, 0)),           # Wo (resident)
        pl.BlockSpec((1, E), lambda b, qi, ki: (0, 0)),           # bo
    ]
    args = [query, k_proj, v_proj, wq, bq, wo, bo]
    if has_mask:
        # int8 mask: 4x less DMA than f32, exact integer compare in-kernel.
        mask_i8 = (jnp.broadcast_to(mask, (B, 1, Sq, Sk)) != 0).astype(jnp.int8)
        in_specs.append(
            pl.BlockSpec((1, 1, tq, tk), lambda b, qi, ki: (b, 0, qi, ki)))
        args.append(mask_i8)

    scratch_shapes = [
        pltpu.VMEM((tq, E), compute_dtype),             # projected, scaled Q
        pltpu.VMEM((num_heads, tq, 1), jnp.float32),    # running max
        pltpu.VMEM((num_heads, tq, 1), jnp.float32),    # running denominator
        pltpu.VMEM((tq, E), jnp.float32),               # context accumulator
    ]

    # Rough VMEM footprint (double-buffered streaming inputs + resident blocks)
    # so the scoped limit is explicit; capped at v7x's 64 MiB physical VMEM.
    esz = jnp.dtype(compute_dtype).itemsize
    vmem_est = (2 * tq * E * 4                      # q tile in + out tile (f32)
                + 2 * 2 * tk * E * esz              # K/V tiles, double buffered
                + 2 * 2 * E * E * esz + 4 * E * 4   # resident Wq/Wo + biases
                + (2 * tq * tk if has_mask else 0)  # int8 mask tile, 2 buffers
                + tq * E * (esz + 4)                # q / acc scratch
                + 2 * num_heads * tq * 128 * 4)     # m / l scratch (lane pad)
    vmem_limit = int(min(64 * 1024 * 1024, max(32 * 1024 * 1024, 2 * vmem_est)))

    kernel = functools.partial(
        _attn_kernel, heads=num_heads, scale=1.0 / math.sqrt(hd),
        has_mask=has_mask, compute_dtype=compute_dtype)

    return pl.pallas_call(
        kernel,
        out_shape=jax.ShapeDtypeStruct((B, Sq, E), jnp.float32),
        grid=grid,
        in_specs=in_specs,
        out_specs=pl.BlockSpec((1, tq, E), lambda b, qi, ki: (b, qi, 0)),
        scratch_shapes=scratch_shapes,
        compiler_params=pltpu.CompilerParams(
            dimension_semantics=("parallel", "parallel", "arbitrary"),
            vmem_limit_bytes=vmem_limit),
    )(*args)


# ----------------------------------------------------------------------------
# Pure-JAX reference (mirrors the PyTorch module) and parameter init
# ----------------------------------------------------------------------------

def mha_reference(params, query, key, value, mask, num_heads):
    B, Sq, E = query.shape
    Sk = key.shape[1]
    hd = E // num_heads
    Q = query @ params["wq"] + params["bq"]
    K = key @ params["wk"] + params["bk"]
    V = value @ params["wv"] + params["bv"]
    Q = Q.reshape(B, Sq, num_heads, hd).transpose(0, 2, 1, 3)
    K = K.reshape(B, Sk, num_heads, hd).transpose(0, 2, 1, 3)
    V = V.reshape(B, Sk, num_heads, hd).transpose(0, 2, 1, 3)
    s = (Q @ jnp.swapaxes(K, -1, -2)) / math.sqrt(hd)
    if mask is not None:
        s = jnp.where(mask == 0, jnp.float32(-1e20), s)
    p = jax.nn.softmax(s, axis=-1)
    attn = (p @ V).transpose(0, 2, 1, 3).reshape(B, Sq, E)
    return attn @ params["wo"] + params["bo"]


def init_mha_params(key, embed_size):
    ks = jax.random.split(key, 8)
    scale = 1.0 / math.sqrt(embed_size)
    def lin(kw, kb):
        w = jax.random.normal(kw, (embed_size, embed_size), jnp.float32) * scale
        b = jax.random.normal(kb, (embed_size,), jnp.float32) * scale
        return w, b
    p = {}
    p["wq"], p["bq"] = lin(ks[0], ks[1])
    p["wk"], p["bk"] = lin(ks[2], ks[3])
    p["wv"], p["bv"] = lin(ks[4], ks[5])
    p["wo"], p["bo"] = lin(ks[6], ks[7])
    return p


# ----------------------------------------------------------------------------
# Main
# ----------------------------------------------------------------------------

if __name__ == "__main__":
    # NOTE: demo shapes (E=32, hd=8, Sq=8) are far below MXU/(8,128) granularity
    # and are for correctness only; benchmark with E >= 128·heads, hd >= 64.
    B, Sq, Sk = 2, 8, 16
    embed_size, num_heads = 32, 4   # head_dim = 8

    root = jax.random.PRNGKey(0)
    kq, kk, kv, kp = jax.random.split(root, 4)
    query = jax.random.normal(kq, (B, Sq, embed_size), jnp.float32)
    key = jax.random.normal(kk, (B, Sk, embed_size), jnp.float32)
    value = jax.random.normal(kv, (B, Sk, embed_size), jnp.float32)
    params = init_mha_params(kp, embed_size)

    # Masked self-attention (causal), mask shared across heads: (B, 1, Sq, Sq).
    causal = jnp.tril(jnp.ones((Sq, Sq), jnp.float32))
    mask = jnp.broadcast_to(causal, (B, 1, Sq, Sq))
    out_masked = multi_head_attention(params, query, query, query, mask,
                                      num_heads=num_heads)
    out_masked = jax.block_until_ready(out_masked)
    ref_masked = mha_reference(params, query, query, query, mask, num_heads)

    # Unmasked cross-attention; block_k=8 exercises the online-softmax Sk tiling
    # (2 kv tiles) and the mask=None trace (no mask DMA at all).
    out_plain = multi_head_attention(params, query, key, value, None,
                                     num_heads=num_heads, block_k=8)
    out_plain = jax.block_until_ready(out_plain)
    ref_plain = mha_reference(params, query, key, value, None, num_heads)

    assert out_masked.shape == (B, Sq, embed_size)
    assert out_plain.shape == (B, Sq, embed_size)
    assert bool(jnp.all(jnp.isfinite(out_masked)))
    assert bool(jnp.all(jnp.isfinite(out_plain)))
    # Tolerance covers the bf16 MXU operands (f32 accumulation).
    assert bool(jnp.allclose(out_masked, ref_masked, atol=4e-2, rtol=4e-2)), (
        "masked MHA mismatch")
    assert bool(jnp.allclose(out_plain, ref_plain, atol=4e-2, rtol=4e-2)), (
        "unmasked MHA mismatch")

    print("KERNEL_OK")
</pallas_src>

<mosaic_0001>
module attributes {stable_mosaic.version = 11 : i64} {
  func.func @_kv_proj_kernel(%arg0: i32, %arg1: i32, %arg2: memref<1x8x32xf32, #tpu.memory_space<vmem>>, %arg3: memref<1x8x32xf32, #tpu.memory_space<vmem>>, %arg4: memref<32x32xbf16, #tpu.memory_space<vmem>>, %arg5: memref<1x32xf32, #tpu.memory_space<vmem>>, %arg6: memref<32x32xbf16, #tpu.memory_space<vmem>>, %arg7: memref<1x32xf32, #tpu.memory_space<vmem>>, %arg8: memref<1x8x32xbf16, #tpu.memory_space<vmem>>, %arg9: memref<1x8x32xbf16, #tpu.memory_space<vmem>>) attributes {dimension_semantics = [#tpu.dimension_semantics<parallel>, #tpu.dimension_semantics<parallel>], iteration_bounds = array<i64: 2, 1>, scalar_prefetch = 0 : i64, scratch_operands = 0 : i64, tpu.core_type = #tpu.core_type<tc>, window_params = [{transform_indices = @transform_0, window_bounds = array<i64: 1, 8, 32>}, {transform_indices = @transform_1, window_bounds = array<i64: 1, 8, 32>}, {pipeline_mode = #tpu.pipeline_mode<synchronous>, transform_indices = @transform_2, window_bounds = array<i64: 32, 32>}, {pipeline_mode = #tpu.pipeline_mode<synchronous>, transform_indices = @transform_3, window_bounds = array<i64: 1, 32>}, {pipeline_mode = #tpu.pipeline_mode<synchronous>, transform_indices = @transform_4, window_bounds = array<i64: 32, 32>}, {pipeline_mode = #tpu.pipeline_mode<synchronous>, transform_indices = @transform_5, window_bounds = array<i64: 1, 32>}, {transform_indices = @transform_6, window_bounds = array<i64: 1, 8, 32>}, {transform_indices = @transform_7, window_bounds = array<i64: 1, 8, 32>}]} {
    %c0 = arith.constant 0 : index
    %c0_0 = arith.constant 0 : index
    %c0_1 = arith.constant 0 : index
    %0 = vector.load %arg2[%c0, %c0_0, %c0_1] : memref<1x8x32xf32, #tpu.memory_space<vmem>>, vector<1x8x32xf32>
    %1 = vector.shape_cast %0 : vector<1x8x32xf32> to vector<8x32xf32>
    %c0_2 = arith.constant 0 : index
    %c0_3 = arith.constant 0 : index
    %2 = vector.load %arg4[%c0_2, %c0_3] : memref<32x32xbf16, #tpu.memory_space<vmem>>, vector<32x32xbf16>
    %3 = arith.truncf %1 : vector<8x32xf32> to vector<8x32xbf16>
    %cst = arith.constant dense<0.000000e+00> : vector<8x32xf32>
    %4 = tpu.matmul %3, %2, %cst {dimension_numbers = #tpu.dot_dimension_numbers<[1], [0], [0], [1], [0, 0, 1, 1], [], []>} : vector<8x32xbf16>, vector<32x32xbf16>, vector<8x32xf32> -> vector<8x32xf32>
    %c0_4 = arith.constant 0 : index
    %c0_5 = arith.constant 0 : index
    %5 = vector.load %arg5[%c0_4, %c0_5] : memref<1x32xf32, #tpu.memory_space<vmem>>, vector<1x32xf32>
    %6 = vector.broadcast %5 : vector<1x32xf32> to vector<8x32xf32>
    %7 = arith.addf %4, %6 : vector<8x32xf32>
    %c0_6 = arith.constant 0 : index
    %c0_7 = arith.constant 0 : index
    %c0_8 = arith.constant 0 : index
    %8 = vector.load %arg3[%c0_6, %c0_7, %c0_8] : memref<1x8x32xf32, #tpu.memory_space<vmem>>, vector<1x8x32xf32>
    %9 = vector.shape_cast %8 : vector<1x8x32xf32> to vector<8x32xf32>
    %c0_9 = arith.constant 0 : index
    %c0_10 = arith.constant 0 : index
    %10 = vector.load %arg6[%c0_9, %c0_10] : memref<32x32xbf16, #tpu.memory_space<vmem>>, vector<32x32xbf16>
    %11 = arith.truncf %9 : vector<8x32xf32> to vector<8x32xbf16>
    %cst_11 = arith.constant dense<0.000000e+00> : vector<8x32xf32>
    %12 = tpu.matmul %11, %10, %cst_11 {dimension_numbers = #tpu.dot_dimension_numbers<[1], [0], [0], [1], [0, 0, 1, 1], [], []>} : vector<8x32xbf16>, vector<32x32xbf16>, vector<8x32xf32> -> vector<8x32xf32>
    %c0_12 = arith.constant 0 : index
    %c0_13 = arith.constant 0 : index
    %13 = vector.load %arg7[%c0_12, %c0_13] : memref<1x32xf32, #tpu.memory_space<vmem>>, vector<1x32xf32>
    %14 = vector.broadcast %13 : vector<1x32xf32> to vector<8x32xf32>
    %15 = arith.addf %12, %14 : vector<8x32xf32>
    %16 = arith.truncf %7 : vector<8x32xf32> to vector<8x32xbf16>
    %c0_14 = arith.constant 0 : index
    %c0_15 = arith.constant 0 : index
    %c0_16 = arith.constant 0 : index
    %17 = vector.load %arg8[%c0_14, %c0_15, %c0_16] : memref<1x8x32xbf16, #tpu.memory_space<vmem>>, vector<1x8x32xbf16>
    %18 = vector.shape_cast %17 : vector<1x8x32xbf16> to vector<8x32xbf16>
    %19 = vector.shape_cast %16 : vector<8x32xbf16> to vector<1x8x32xbf16>
    tpu.vector_store %arg8[%c0_14, %c0_15, %c0_16], %19 {strides = array<i32>} : memref<1x8x32xbf16, #tpu.memory_space<vmem>>, vector<1x8x32xbf16>,
    %20 = arith.truncf %15 : vector<8x32xf32> to vector<8x32xbf16>
    %c0_17 = arith.constant 0 : index
    %c0_18 = arith.constant 0 : index
    %c0_19 = arith.constant 0 : index
    %21 = vector.load %arg9[%c0_17, %c0_18, %c0_19] : memref<1x8x32xbf16, #tpu.memory_space<vmem>>, vector<1x8x32xbf16>
    %22 = vector.shape_cast %21 : vector<1x8x32xbf16> to vector<8x32xbf16>
    %23 = vector.shape_cast %20 : vector<8x32xbf16> to vector<1x8x32xbf16>
    tpu.vector_store %arg9[%c0_17, %c0_18, %c0_19], %23 {strides = array<i32>} : memref<1x8x32xbf16, #tpu.memory_space<vmem>>, vector<1x8x32xbf16>,
    return
  }
  func.func @transform_0(%arg0: i32, %arg1: i32) -> (i32, i32, i32) {
    %c0_i32 = arith.constant 0 : i32
    %c0_i32_0 = arith.constant 0 : i32
    return %arg0, %arg1, %c0_i32 : i32, i32, i32
  }
  func.func @transform_1(%arg0: i32, %arg1: i32) -> (i32, i32, i32) {
    %c0_i32 = arith.constant 0 : i32
    %c0_i32_0 = arith.constant 0 : i32
    return %arg0, %arg1, %c0_i32 : i32, i32, i32
  }
  func.func @transform_2(%arg0: i32, %arg1: i32) -> (i32, i32) {
    %c0_i32 = arith.constant 0 : i32
    %c0_i32_0 = arith.constant 0 : i32
    %c0_i32_1 = arith.constant 0 : i32
    return %c0_i32, %c0_i32_0 : i32, i32
  }
  func.func @transform_3(%arg0: i32, %arg1: i32) -> (i32, i32) {
    %c0_i32 = arith.constant 0 : i32
    %c0_i32_0 = arith.constant 0 : i32
    %c0_i32_1 = arith.constant 0 : i32
    return %c0_i32, %c0_i32_0 : i32, i32
  }
  func.func @transform_4(%arg0: i32, %arg1: i32) -> (i32, i32) {
    %c0_i32 = arith.constant 0 : i32
    %c0_i32_0 = arith.constant 0 : i32
    %c0_i32_1 = arith.constant 0 : i32
    return %c0_i32, %c0_i32_0 : i32, i32
  }
  func.func @transform_5(%arg0: i32, %arg1: i32) -> (i32, i32) {
    %c0_i32 = arith.constant 0 : i32
    %c0_i32_0 = arith.constant 0 : i32
    %c0_i32_1 = arith.constant 0 : i32
    return %c0_i32, %c0_i32_0 : i32, i32
  }
  func.func @transform_6(%arg0: i32, %arg1: i32) -> (i32, i32, i32) {
    %c0_i32 = arith.constant 0 : i32
    %c0_i32_0 = arith.constant 0 : i32
    return %arg0, %arg1, %c0_i32 : i32, i32, i32
  }
  func.func @transform_7(%arg0: i32, %arg1: i32) -> (i32, i32, i32) {
    %c0_i32 = arith.constant 0 : i32
    %c0_i32_0 = arith.constant 0 : i32
    return %arg0, %arg1, %c0_i32 : i32, i32, i32
  }
}

</mosaic_0001>

<bundles_post_ra>
// kernel: tpu_custom_call.1
= control target key start
LH: loop header
LB: loop body
LE: loop exit
PB: predicated region body
PF: predicated region fallthrough
CT: control target
= control target key end

     0   :  { %s1500_s0 = inlined_call_operand.hbm [shape: f32[2,8,32], index: 0, kind: input, shape index: {}]   ;;  %s1501_s1 = inlined_call_operand.hbm [shape: f32[2,8,32], index: 1, kind: input, shape index: {}]   ;;  %s1502_s2 = inlined_call_operand.hbm [shape: bf16[32,32], index: 2, kind: input, shape index: {}]   ;;  %s1503_s3 = inlined_call_operand.vmem [shape: f32[1,32], index: 3, kind: input, shape index: {}]   ;;  %s1504_s4 = inlined_call_operand.hbm [shape: bf16[32,32], index: 4, kind: input, shape index: {}]   ;;  %s1505_s5 = inlined_call_operand.vmem [shape: f32[1,32], index: 5, kind: input, shape index: {}]   ;;  %s1506_s6 = inlined_call_operand.hbm [shape: bf16[2,8,32], index: 6, kind: output, shape index: {0}]   ;;  %s1507_s7 = inlined_call_operand.hbm [shape: bf16[2,8,32], index: 7, kind: output, shape index: {1}]  }
   0x1   :  { %1515 = sst [smem:[#allocation23_spill]] %s1502_s2 }
   0x2   :  { %1516 = sst [smem:[#allocation24_spill]] %s1504_s4 }
   0x3   :  { %13 = vsyncpa [#allocation3], 0 }
   0x4   :  { %15 = vsyncpa [#allocation3 + $0x1], 0 }
   0x5   :  { %16 = vsyncpa [#allocation6], 0 }
   0x6   :  { %18 = vsyncpa [#allocation6 + $0x1], 0 }
   0x7   :  { %19 = vsyncpa [#allocation9], 0 }
   0x8   :  { %20 = vsyncpa [#allocation4], 0 }
   0x9   :  { %22 = vsyncpa [#allocation4 + $0x1], 0 }
   0xa   :  { %23 = vsyncpa [#allocation12], 0 }
   0xb   :  { %25 = vsyncpa [#allocation12 + $0x1], 0  ;;  %s1174_s24 = smov 0   ;;  %s1176_s25 = smov 0  }
   0xc   :  { %s1178_s26 = smov 0   ;;  %s1180_s27 = smov 0  }
   0xd   :  { %s1182_s28 = smov 0   ;;  %s1184_s29 = smov 0  }
   0xe LB: > { %1517 = sst [smem:[#allocation19_spill]] %s1118_s28  ;;  %s1205_s30 = sadd.s32 4294967295, %s1122_s29   ;;  %s1122_s29 = sphi %s1184_s29, %s31_s29   ;;  %s1118_s28 = sphi %s1182_s28, %s1542_s28   ;;  %s1114_s27 = sphi %s1180_s27, %s1541_s27   ;;  %s1110_s26 = sphi %s1178_s26, %s1545_s26   ;;  %s1106_s25 = sphi %s1176_s25, %s1544_s25   ;;  %s1102_s24 = sphi %s1174_s24, %s1543_s24  }
   0xf   : > { %s727_s8 = sadd.s32 4294967294, %s1122_s29   ;;  %p65_p0 = scmp.ne.s32.totalorder %s1106_s25, %s1102_s24 }
  0x10   : > { %p1508_p1 = scmp.eq.s32.totalorder %s1205_s30, 0  ;;  %p209_p3 = scmp.eq.s32.totalorder %s727_s8, 1 }
  0x11   : > { %p728_p5 = scmp.ge.s32.totalorder %s1122_s29, 1  ;;  %p244_p7 = scmp.lt.s32.totalorder %s1122_s29, 3 }
  0x12   : > { %p1214_p4 = por %p1508_p1, %p65_p0  ;;  %p1219_p6 = por %p209_p3, %p65_p0 }
  0x13   : > { %p1224_p8 = pnand %p728_p5, %p244_p7  ;;  %s1124_s12 = smov [#allocation7]  }
  0x14   : > { %s1518_s9 = scalar_select %p1214_p4, 1, 0 }
  0x15   : > { %s1519_s10 = scalar_select %p1219_p6, 1, 0 }
  0x16   : > { %s1521_s11 = scalar_select %p1224_p8, 1, 0 }
  0x17   : > { %1520 = sst [smem:[#allocation20_spill]] %s1519_s10  ;;  %s256_s13 = sshll.u32 %s1124_s12, 4  ;;  %s1228_s13 = int_to_ptr.vmem [resolvable:$true] %s256_s13 }
  0x18   : > { %p795_p9 = pneg %p1224_p8  ;;  %s1125_s15 = smov [#allocation8]  }
  0x19   : > { %s272_s16 = sshll.u32 %s1125_s15, 4  ;;  %s1523_s2 = sld [smem:[#allocation23_spill]]  ;;  %s1239_s16 = int_to_ptr.vmem [resolvable:$true] %s272_s16 }
  0x1a   : > { %p1235_p11 = pnand %p795_p9, %p1508_p1 }
  0x1c   : > { %p882_p13 = pneg %p1235_p11 }
  0x1f   : > { %s880_s19 = scalar_lea.hbm %s1523_s2, 256 }
  0x20   : > { %p881_p12 = scmp.ne.s32.totalorder %s1523_s2, %s880_s19  ;;  %p887_p5 = scmp.lt.u32.totalorder %s880_s19, %s1523_s2 }
  0x22   : > { %p883_p0 = pnand %p882_p13, %p881_p12 }
  0x24   : > { %p884_p3 = pneg %p883_p0 }
  0x26   : > { %p889_p7 = pnand %p887_p5, %p884_p3 }
  0x28   : > { %892 = shalt.err (!%p889_p7)
}
  0x29   : > { %s893_s8 = scalar_lea.vmem %s1228_s13, 256  ;;  %p901_p2 = scmp.lt.s32.totalorder %s1228_s13, %s1228_s13 }
  0x2a   : > { %p894_p9 = scmp.ne.s32.totalorder %s1228_s13, %s893_s8  ;;  %p902_p12 = scmp.lt.s32.totalorder %s893_s8, %s893_s8 }
  0x2c   : > { %p896_p10 = pnand %p894_p9, %p882_p13  ;;  %p903_p0 = por %p902_p12, %p901_p2 }
  0x2e   : > { %p897_p1 = pneg %p896_p10 }
  0x30   : > { %p904_p6 = pnand %p903_p0, %p897_p1 }
  0x32   : > { %907 = shalt.err (!%p904_p6)
}
  0x33   : > { %s1126_s12 = smov 64   ;;  %s1127_s15 = smov 4  }
  0x34   : > { %798 = dma.hbm_to_vmem [thread:$0]  (!%p1235_p11), %s1523_s2, 256, %s1228_s13, [#allocation6], %s1126_s12, %s1126_s12, %s1127_s15  }
  0x35   : > { %s1524_s4 = sld [smem:[#allocation24_spill]] }
  0x3b   : > { %s908_s21 = scalar_lea.hbm %s1524_s4, 256 }
  0x3c   : > { %p909_p2 = scmp.ne.s32.totalorder %s1524_s4, %s908_s21  ;;  %p915_p10 = scmp.lt.u32.totalorder %s908_s21, %s1524_s4 }
  0x3e   : > { %p911_p1 = pnand %p909_p2, %p882_p13 }
  0x40   : > { %p912_p6 = pneg %p911_p1 }
  0x42   : > { %p917_p3 = pnand %p915_p10, %p912_p6 }
  0x44   : > { %920 = shalt.err (!%p917_p3)
}
  0x45   : > { %s921_s13 = scalar_lea.vmem %s1239_s16, 256  ;;  %p929_p12 = scmp.lt.s32.totalorder %s1239_s16, %s1239_s16 }
  0x46   : > { %p922_p5 = scmp.ne.s32.totalorder %s1239_s16, %s921_s13  ;;  %p930_p0 = scmp.lt.s32.totalorder %s921_s13, %s921_s13 }
  0x48   : > { %p924_p7 = pnand %p922_p5, %p882_p13  ;;  %p931_p2 = por %p930_p0, %p929_p12 }
  0x4a   : > { %p925_p9 = pneg %p924_p7 }
  0x4c   : > { %p932_p1 = pnand %p931_p2, %p925_p9 }
  0x4e   : > { %935 = shalt.err (!%p932_p1)
}
  0x4f   : > { %801 = dma.hbm_to_vmem [thread:$0]  (!%p1235_p11), %s1524_s4, 256, %s1239_s16, [#allocation9], %s1126_s12, %s1126_s12, %s1127_s15  }
  0x50   : > { %s43_s18 = sadd.s32 1, %s1118_s28  ;;  %s52_s19 = sadd.s32 1, %s1110_s26 }
  0x51   : > { %p45_p13 = scmp.ge.s32.totalorder %s43_s18, 2  ;;  %p59_p6 = scmp.ne.s32.totalorder %s1110_s26, %s1106_s25 }
  0x52   : > { %p60_p10 = scmp.eq.s32.totalorder %s1122_s29, 0  ;;  %p818_p3 = scmp.lt.s32.totalorder %s1122_s29, 2 }
  0x53   : > { %s1547_s18 = smov (%p45_p13, %s43_s18), 0  ;;  %p1526_p7 = scmp.eq.s32.totalorder %s1205_s30, 1 }
  0x54   : > { %1525 = sst [smem:[#allocation21_spill]] %s1547_s18  ;;  %p61_p5 = por %p60_p10, %p59_p6 }
  0x55   : > { %p1303_p9 = por %p1526_p7, %p59_p6  ;;  %s47_s20 = ssub.s32 %s1118_s28, %s1547_s18 }
  0x56   : > { %s289_s21 = sand.u32 1, %s1110_s26   ;;  %p50_p12 = scmp.eq.s32.totalorder %s47_s20, 0 }
  0x57   : > { %s1527_s14 = scalar_select %p1303_p9, 1, 0 }
  0x58   : > { %s1310_s16 = sshll.u32 %s289_s21, 3  ;;  %s733_s12 = sshll.u32 %s1118_s28, 7 }
  0x59   : > { %s1314_s15 = scalar_select %p50_p12, %s1110_s26, %s52_s19  }
  0x5a   : > { %s1319_s8 = scalar_lea.hbm %s1500_s0, %s733_s12  ;;  %s293_s13 = scalar_lea.vmem [#allocation2], %s1310_s16 }
  0x5b   : > { %1528 = sst [smem:[#allocation22_spill]] %s1314_s15  ;;  %s301_s10 = sshll.u32 %s293_s13, 4  ;;  %s1328_s10 = int_to_ptr.vmem [resolvable:$true] %s301_s10 }
  0x5c   : > { %p1324_p11 = pnand %p818_p3, %p61_p5  ;;  %s1333_s22 = scalar_lea.hbm %s1501_s1, %s733_s12 }
  0x5d   : > { %s290_s23 = scalar_lea.sflag [#allocation3], %s289_s21  ;;  %s936_s2 = scalar_lea.hbm %s1319_s8, 128 }
  0x5e   : > { %p937_p0 = scmp.ne.s32.totalorder %s1319_s8, %s936_s2  ;;  %p938_p2 = pneg %p1324_p11 }
  0x5f   : > { %s941_s18 = scalar_lea.hbm %s1500_s0, 256  ;;  %p942_p6 = scmp.lt.u32.totalorder %s1319_s8, %s1500_s0 }
  0x60   : > { %p939_p1 = pnand %p938_p2, %p937_p0  ;;  %p943_p10 = scmp.lt.u32.totalorder %s941_s18, %s936_s2 }
  0x61   : > { %p945_p5 = scmp.lt.u32.totalorder %s936_s2, %s1319_s8 }
  0x62   : > { %p940_p13 = pneg %p939_p1  ;;  %p944_p3 = por %p943_p10, %p942_p6 }
  0x64   : > { %p946_p7 = por %p945_p5, %p944_p3 }
  0x66   : > { %p947_p12 = pnand %p946_p7, %p940_p13 }
  0x68   : > { %950 = shalt.err (!%p947_p12)
}
  0x69   : > { %s951_s21 = scalar_lea.vmem %s1328_s10, 128  ;;  %s1128_s4 = smov [#allocation2]  }
  0x6a   : > { %p952_p0 = scmp.ne.s32.totalorder %s1328_s10, %s951_s21  ;;  %s956_s12 = sshll.u32 %s1128_s4, 4  ;;  %s957_s12 = int_to_ptr.vmem [resolvable:$false] %s956_s12 }
  0x6b   : > { %s958_s28 = scalar_lea.vmem %s957_s12, 256  ;;  %p959_p4 = scmp.lt.s32.totalorder %s1328_s10, %s957_s12 }
  0x6c   : > { %p954_p1 = pnand %p952_p0, %p938_p2  ;;  %p960_p6 = scmp.lt.s32.totalorder %s958_s28, %s951_s21 }
  0x6e   : > { %p955_p9 = pneg %p954_p1  ;;  %p961_p10 = por %p960_p6, %p959_p4 }
  0x70   : > { %p962_p3 = pnand %p961_p10, %p955_p9 }
  0x72   : > { %965 = shalt.err (!%p962_p3)
}
  0x73   : > { %805 = dma.hbm_to_vmem [thread:$0]  (!%p1324_p11), %s1319_s8, 128, %s1328_s10, %s290_s23  }
  0x74   : > { %s308_s2 = sand.u32 1, %s1122_s29   ;;  %s312_s18 = scalar_lea.vmem [#allocation5], %s1310_s16 }
  0x75   : > { %s320_s15 = sshll.u32 %s312_s18, 4  ;;  %s309_s19 = scalar_lea.sflag [#allocation6], %s308_s2  ;;  %s321_s15 = int_to_ptr.vmem [resolvable:$true] %s320_s15 }
  0x76   : > { %s966_s20 = scalar_lea.hbm %s1333_s22, 128  ;;  %s971_s4 = scalar_lea.hbm %s1501_s1, 256 }
  0x77   : > { %p967_p4 = scmp.ne.s32.totalorder %s1333_s22, %s966_s20  ;;  %p972_p5 = scmp.lt.u32.totalorder %s1333_s22, %s1501_s1 }
  0x78   : > { %p973_p7 = scmp.lt.u32.totalorder %s971_s4, %s966_s20  ;;  %p975_p0 = scmp.lt.u32.totalorder %s966_s20, %s1333_s22 }
  0x79   : > { %p969_p9 = pnand %p967_p4, %p938_p2 }
  0x7a   : > { %p974_p12 = por %p973_p7, %p972_p5 }
  0x7b   : > { %p970_p13 = pneg %p969_p9 }
  0x7c   : > { %p976_p1 = por %p975_p0, %p974_p12 }
  0x7e   : > { %p977_p6 = pnand %p976_p1, %p970_p13 }
  0x80   : > { %980 = shalt.err (!%p977_p6)
}
  0x81   : > { %s981_s16 = scalar_lea.vmem %s321_s15, 128  ;;  %s1129_s8 = smov [#allocation5]  }
  0x82   : > { %p982_p10 = scmp.ne.s32.totalorder %s321_s15, %s981_s16  ;;  %s986_s10 = sshll.u32 %s1129_s8, 4  ;;  %s987_s10 = int_to_ptr.vmem [resolvable:$false] %s986_s10 }
  0x83   : > { %s988_s23 = scalar_lea.vmem %s987_s10, 256  ;;  %p989_p9 = scmp.lt.s32.totalorder %s321_s15, %s987_s10 }
  0x84   : > { %p984_p3 = pnand %p982_p10, %p938_p2  ;;  %p990_p8 = scmp.lt.s32.totalorder %s988_s23, %s981_s16 }
  0x86   : > { %p985_p4 = pneg %p984_p3  ;;  %p991_p5 = por %p990_p8, %p989_p9 }
  0x88   : > { %p992_p7 = pnand %p991_p5, %p985_p4 }
  0x8a   : > { %995 = shalt.err (!%p992_p7)
}
  0x8b   : > { %808 = dma.hbm_to_vmem [thread:$0]  (!%p1324_p11), %s1333_s22, 128, %s321_s15, %s309_s19  }
  0x8c   : > { %p1530_p13 = scmp.ne.s32.totalorder %s1521_s11, 0 }
  0x8d   : > { %s1384_s2 = sand.u32 (!%p1530_p13), 1, %s1106_s25   ;;  %p1531_p2 = scmp.ne.s32.totalorder (!%p1530_p13), %s1518_s9, 0 }
  0x8e   : > { %329 = sbr.rel (%p1530_p13) target bundleno = 422 (0x1a6), region = 44  ;;  %s737_s18 = sshll.u32 (!%p1530_p13), %s1384_s2, 3 }
  0x8f   : > { %s332_s20 = scalar_lea.sflag (!%p1530_p13), [#allocation3], %s1384_s2  ;;  %s335_s13 = scalar_lea.vmem (!%p1530_p13), [#allocation2], %s737_s18 }
  0x95   : > { %1077 = dma.done.wait (%p1531_p2), %s332_s20, 128  }
  0x96   : > { %1079 = vsyncadd (%p1531_p2), %s332_s20, 4294967168  ;;  %s340_s17 = sand.u32 1, %s1205_s30   ;;  %s344_s11 = scalar_lea.vmem [#allocation5], %s737_s18 }
  0x97   : > { %s341_s22 = scalar_lea.sflag [#allocation6], %s340_s17 }
  0x98   : > { %1081 = dma.done.wait (%p1531_p2), %s341_s22, 128  }
  0x99   : > { %1083 = vsyncadd (%p1531_p2), %s341_s22, 4294967168  ;;  %p1532_p8 = scmp.eq.s32.totalorder %s1205_s30, 0 }
  0x9b   : > { %1085 = dma.done.wait (%p1532_p8), [#allocation6], 256   ;;  %p1533_p11 = pmov %p1532_p8 }
  0x9c   : > { %p1534_p12 = pmov %p1532_p8 }
  0x9d   : > { %1087 = vsyncadd (%p1533_p11), [#allocation6], 4294967040 }
  0x9e   : > { %1089 = dma.done.wait (%p1534_p12), [#allocation9], 256   ;;  %p1535_p0 = pmov %p1532_p8 }
  0x9f   : > { %v1130_v0 = vmov 0.0   ;;  %vm1131_vm0 = vmmov 0   ;;  %v876_v1 = vld [vmem:[#allocation7] sm:$0xff]   ;;  %v877_v2 = vld [vmem:[#allocation8] sm:$0xff]   ;;  %v878_v3 = vld [vmem:[#allocation7 + $0x8] sm:$0xff]   ;;  %vm419_vm1 = vcmask 261120  }
  0xa0   : > { %1091 = vsyncadd (%p1535_p0), [#allocation9], 4294967040  ;;  %763 = vmatprep.subr.bf16.mxu0 %v1130_v0  ;;  %771 = vmatprep.subr.bf16.mxu1 %v1130_v0  ;;  %v879_v4 = vld [vmem:[#allocation8 + $0x8] sm:$0xff]   ;;  %v394_v5 = vld [vmem:[%s335_s13] sm:$0xff]  ;;  %s741_s30 = sshll.u32 %s1384_s2, 2  ;;  %s753_s4 = sshll.u32 %s1114_s27, 6 }
  0xa1   : > { %767 = vmatprep.mubr.msk.bf16.mxu0 %vm1131_vm0, %v1130_v0  ;;  %775 = vmatprep.mubr.msk.bf16.mxu1 %vm1131_vm0, %v1130_v0  ;;  %v463_v6 = vld [vmem:[%s344_s11] sm:$0xff]  ;;  %v399_v7 = vpack.c.bf16 %v394_v5, %v394_v5  ;;  %v743_v9 = vld [vmem:[%s1503_s3] ss:$0 sm:$0xff]  ;;  %s385_s12 = scalar_lea.vmem [#allocation10], %s741_s30  ;;  %s1413_s16 = scalar_lea.vmem [#allocation11], %s741_s30  ;;  %vm532_vm2 = vcmask 257024  }
  0xa2   : > { %764 = vmatpush3.bf16.msra.mxu0 %v876_v1  ;;  %772 = vmatpush3.bf16.msra.mxu1 %v877_v2  ;;  %v468_v8 = vpack.c.bf16 %v463_v6, %v463_v6  ;;  %v747_v10 = vld [vmem:[%s1505_s5] ss:$0 sm:$0xff]  ;;  %s556_s28 = sshll.u32 %s385_s12, 4  ;;  %s570_s8 = sshll.u32 %s1413_s16, 4  ;;  %s1421_s28 = int_to_ptr.vmem [resolvable:$true] %s556_s28  ;;  %s1428_s8 = int_to_ptr.vmem [resolvable:$true] %s570_s8 }
  0xa3   : > { %765 = vmatprep.subr.bf16.mxu0 %v1130_v0  ;;  %773 = vmatprep.subr.bf16.mxu1 %v1130_v0  ;;  %s1419_s27 = scalar_lea.hbm %s1506_s6, %s753_s4  ;;  %s1426_s13 = scalar_lea.hbm %s1507_s7, %s753_s4 }
  0xa4   : > { %s537_s17 = scalar_lea.sflag [#allocation4], %s1384_s2  ;;  %s996_s22 = scalar_lea.vmem %s1421_s28, 64 }
  0xa5   : > { %p997_p1 = scmp.ne.s32.totalorder %s1421_s28, %s996_s22  ;;  %p1536_p6 = scmp.ne.s32.totalorder %s1527_s14, 0 }
  0xa6   : > { %766 = vmatpush3.bf16.msra.mxu0 %v878_v3  ;;  %774 = vmatpush3.bf16.msra.mxu1 %v879_v4  ;;  %s1132_s11 = smov [#allocation10]  }
  0xa7   : > { %p998_p10 = pnand %p997_p1, %p1536_p6  ;;  %s1000_s30 = sshll.u32 %s1132_s11, 4  ;;  %s1001_s30 = int_to_ptr.vmem [resolvable:$false] %s1000_s30 }
  0xa8   : > { %s1002_s9 = scalar_lea.vmem %s1001_s30, 128  ;;  %p1003_p4 = scmp.lt.s32.totalorder %s1421_s28, %s1001_s30 }
  0xa9   : > { %768 = vmatmul.mubr.msk.bf16.vlgmr.msra.gmra.mrb[0].mxu0 %vm419_vm1, %v399_v7  ;;  %776 = vmatmul.mubr.msk.bf16.vlgmr.msra.gmra.mrb[0].mxu1 %vm419_vm1, %v468_v8  ;;  %p999_p3 = pneg %p998_p10  ;;  %p1004_p9 = scmp.lt.s32.totalorder %s1002_s9, %s996_s22 }
  0xab   : > { %p1005_p5 = por %p1004_p9, %p1003_p4 }
  0xad   : > { %p1006_p7 = pnand %p1005_p5, %p999_p3 }
 0x17c   : > { %v457_v11 = vpop.f32.mrb[0].mxu0  ;;  %v525_v13 = vpop.f32.mrb[0].mxu1 }
 0x17d   : > { %v458_v12 = vadd.f32 %v743_v9, %v457_v11  ;;  %v769_v14 = vpop.f32.mrb[1].mxu0  ;;  %v526_v15 = vadd.f32 %v747_v10, %v525_v13  ;;  %v777_v16 = vpop.f32.mrb[1].mxu1 }
 0x17e   : > { %v460_v17 = vpop.f32.mrb[2].mxu0  ;;  %v528_v19 = vpop.f32.mrb[2].mxu1 }
 0x17f   : > { %v531_v18 = vpack.c.bf16 %v458_v12, %v458_v12  ;;  %v770_v20 = vpop.f32.mrb[3].mxu0  ;;  %v534_v21 = vpack.c.bf16 %v526_v15, %v526_v15  ;;  %v778_v22 = vpop.f32.mrb[3].mxu1 }
 0x181   : > { %533 = vst.msk [vmem:[%s385_s12] sm:$0xf] %vm532_vm2, %v531_v18 }
 0x182   : > { %1009 = shalt.err (!%p1006_p7)
}
 0x183   : > { %s1010_s15 = scalar_lea.hbm %s1419_s27, 64  ;;  %s1014_s4 = scalar_lea.hbm %s1506_s6, 128 }
 0x184   : > { %p1011_p13 = scmp.ne.s32.totalorder %s1419_s27, %s1010_s15  ;;  %p1015_p11 = scmp.lt.u32.totalorder %s1419_s27, %s1506_s6 }
 0x185   : > { %p1016_p12 = scmp.lt.u32.totalorder %s1014_s4, %s1010_s15  ;;  %p1018_p1 = scmp.lt.u32.totalorder %s1010_s15, %s1419_s27 }
 0x186   : > { %p1012_p2 = pnand %p1011_p13, %p1536_p6 }
 0x187   : > { %p1017_p0 = por %p1016_p12, %p1015_p11 }
 0x188   : > { %p1013_p8 = pneg %p1012_p2 }
 0x189   : > { %p1019_p10 = por %p1018_p1, %p1017_p0 }
 0x18b   : > { %p1020_p3 = pnand %p1019_p10, %p1013_p8 }
 0x18d   : > { %1023 = shalt.err (!%p1020_p3)
}
 0x18e   : > { %791 = dma.vmem_to_hbm [thread:$0]  (%p1536_p6), %s1421_s28, 64, %s1419_s27, %s537_s17   ;;  %535 = vst.msk [vmem:[%s1413_s16] sm:$0xf] %vm532_vm2, %v534_v21 }
 0x18f   : > { %s542_s23 = scalar_lea.sflag [#allocation12], %s1384_s2  ;;  %s1024_s18 = scalar_lea.vmem %s1428_s8, 64 }
 0x190   : > { %p1025_p4 = scmp.ne.s32.totalorder %s1428_s8, %s1024_s18  ;;  %s1133_s20 = smov [#allocation11]  }
 0x191   : > { %s1028_s22 = sshll.u32 %s1133_s20, 4  ;;  %s1029_s22 = int_to_ptr.vmem [resolvable:$false] %s1028_s22 }
 0x192   : > { %p1026_p9 = pnand %p1025_p4, %p1536_p6  ;;  %s1030_s11 = scalar_lea.vmem %s1029_s22, 128 }
 0x193   : > { %p1031_p7 = scmp.lt.s32.totalorder %s1428_s8, %s1029_s22  ;;  %p1032_p13 = scmp.lt.s32.totalorder %s1030_s11, %s1024_s18 }
 0x194   : > { %p1027_p5 = pneg %p1026_p9 }
 0x195   : > { %p1033_p2 = por %p1032_p13, %p1031_p7 }
 0x197   : > { %p1034_p8 = pnand %p1033_p2, %p1027_p5 }
 0x199   : > { %1037 = shalt.err (!%p1034_p8)
}
 0x19a   : > { %s1038_s2 = scalar_lea.hbm %s1426_s13, 64  ;;  %s1042_s27 = scalar_lea.hbm %s1507_s7, 128 }
 0x19b   : > { %p1039_p11 = scmp.ne.s32.totalorder %s1426_s13, %s1038_s2  ;;  %p1043_p1 = scmp.lt.u32.totalorder %s1426_s13, %s1507_s7 }
 0x19c   : > { %p1044_p10 = scmp.lt.u32.totalorder %s1042_s27, %s1038_s2  ;;  %p1046_p4 = scmp.lt.u32.totalorder %s1038_s2, %s1426_s13 }
 0x19d   : > { %p1040_p12 = pnand %p1039_p11, %p1536_p6 }
 0x19e   : > { %p1045_p3 = por %p1044_p10, %p1043_p1 }
 0x19f   : > { %p1041_p0 = pneg %p1040_p12 }
 0x1a0   : > { %p1047_p9 = por %p1046_p4, %p1045_p3 }
 0x1a2   : > { %p1048_p5 = pnand %p1047_p9, %p1041_p0 }
 0x1a4   : > { %1051 = shalt.err (!%p1048_p5)
}
 0x1a5   : > { %792 = dma.vmem_to_hbm [thread:$0]  (%p1536_p6), %s1428_s8, 64, %s1426_s13, %s542_s23  }
 0x1a6 PF: > { %s1537_s9 = sld [smem:[#allocation20_spill]]  ;;  %s582_s15 = sand.u32 1, %s1102_s24  }
 0x1a7   : > { %p1539_p13 = scmp.ge.s32.totalorder %s1122_s29, 2  ;;  %s583_s19 = scalar_lea.sflag [#allocation4], %s582_s15 }
 0x1ac   : > { %p1538_p7 = scmp.ne.s32.totalorder %s1537_s9, 0 }
 0x1ae   : > { %p810_p2 = pnand %p1539_p13, %p1538_p7 }
 0x1b0   : > { %1093 = dma.done.wait (!%p810_p2), %s583_s19, 64  }
 0x1b1   : > { %1095 = vsyncadd (!%p810_p2), %s583_s19, 4294967232  ;;  %s592_s21 = scalar_lea.sflag [#allocation12], %s582_s15 }
 0x1b2   : > { %1097 = dma.done.wait (!%p810_p2), %s592_s21, 64  }
 0x1b3   : > { %1099 = vsyncadd (!%p810_p2), %s592_s21, 4294967232  ;;  %s31_s29 = sadd.s32 1, %s1122_s29   ;;  %s1540_s14 = sld [smem:[#allocation22_spill]] }
 0x1b4   : > { %p28_p8 = scmp.ge.s32.totalorder %s31_s29, 4   ;;  %s1541_s27 = sld [smem:[#allocation19_spill]] }
 0x1b5   : > { %s1542_s28 = sld [smem:[#allocation21_spill]]  ;;  %s1543_s24 = smov %s1106_s25 }
 0x1b6   : > { %s1544_s25 = smov %s1110_s26  ;;  %30 = sbr.rel (!%p28_p8) target bundleno = 14 (0xe), region = 127 }
 0x1b9   : > { %s1545_s26 = smov %s1540_s14 }
 0x1bd   :  { %597 = vsyncpa [#allocation3], 1 }
 0x1be   :  { %599 = vsyncpa [#allocation3 + $0x1], 1 }
 0x1bf   :  { %600 = vsyncpa [#allocation6], 1 }
 0x1c0   :  { %602 = vsyncpa [#allocation6 + $0x1], 1 }
 0x1c1   :  { %603 = vsyncpa [#allocation9], 1 }
 0x1c2   :  { %604 = vsyncpa [#allocation4], 1 }
 0x1c3   :  { %606 = vsyncpa [#allocation4 + $0x1], 1 }
 0x1c4   :  { %607 = vsyncpa [#allocation12], 1 }
 0x1c5   :  { %609 = vsyncpa [#allocation12 + $0x1], 1 }

</bundles_post_ra>
